<compile_context>
chip_gen: v5e
topology: v5e:2x2
jax: 0.10.0
libtpu: 0.0.40
codegen_flags: <defaults>
</compile_context>

<pallas_src>
import functools

import jax
import jax.numpy as jnp
from jax.experimental import pallas as pl
from jax.experimental.pallas import tpu as pltpu


def _round_up(n, m):
    return ((n + m - 1) // m) * m


def _xlu_t(a):
    """2-D transpose that always hands Mosaic an (8, 128)-aligned operand.

    Zero-pad (second-minor, minor) up to multiples of (8, 128), transpose the
    aligned block on the XLU, then slice the real result back out.  The pad
    lanes/sublanes already exist physically in the padded vregs, so this adds
    no meaningful XLU work over a "perfect" padded transpose.
    """
    r, c = a.shape
    rp, cp = _round_up(r, 8), _round_up(c, 128)
    if rp != r:
        a = jnp.concatenate([a, jnp.zeros((rp - r, c), a.dtype)], axis=0)
    if cp != c:
        a = jnp.concatenate([a, jnp.zeros((rp, cp - c), a.dtype)], axis=1)
    return a.T[:c, :r]


def _mlp_softmax_kernel(x_ref, p1_ref, p2_ref, p3_ref, o_ref):
    # x_ref: (tb, 8) natural-layout batch tile.  Relayout to lane-dense
    # (features, batch) so the EUP/VPU work (tanh/exp/softmax) runs on dense
    # 128-lane vregs; the relayout rides the otherwise-idle XLU slot.
    x_t = _xlu_t(x_ref[...])                                    # (8, tb)

    w1, b1 = p1_ref[:, :8], p1_ref[:, 8:]                       # (16, 8), (16, 1)
    w2, b2 = p2_ref[:, :16], p2_ref[:, 16:]                     # (16, 16), (16, 1)
    w3, b3 = p3_ref[:, :16], p3_ref[:, 16:]                     # (4, 16),  (4, 1)

    # PyTorch weights are (out, in), so each layer is simply W @ h + b.
    h1 = jnp.tanh(jnp.dot(w1, x_t, preferred_element_type=jnp.float32) + b1)
    h2 = jnp.tanh(jnp.dot(w2, h1, preferred_element_type=jnp.float32) + b2)
    logits = jnp.dot(w3, h2, preferred_element_type=jnp.float32) + b3   # (4, tb)

    # Numerically-stable softmax along the feature (sublane) axis.
    # Exact normalization (no approx reciprocal): rows must sum to 1.
    m = jnp.max(logits, axis=0, keepdims=True)
    e = jnp.exp(logits - m)
    probs = e / jnp.sum(e, axis=0, keepdims=True)               # (4, tb)

    # Back to the caller's (batch, 4) layout; the store block is (tb, 4).
    o_ref[...] = _xlu_t(probs).astype(o_ref.dtype)


@functools.partial(jax.jit, static_argnames=("block_b",))
def policy_gradient_forward(x, params, *, block_b=4096):
    """x: (B, 8) float32.  params: PyTorch-layout weights/biases.

    Returns (B, 4) action probabilities (softmax over the last dim).
    """
    B = x.shape[0]
    block_b = _round_up(block_b, 128)

    # Batch sits on the sublane axis of the I/O blocks (multiple-of-8 is
    # enough); inside the kernel it becomes the lane axis.
    if B >= 256:
        # Largest tile <= block_b that still yields >= 2 grid steps, so the
        # "parallel" batch axis can shard across both TensorCores on v7x.
        tb = min(block_b, _round_up(pl.cdiv(B, 2), 128))
    else:
        tb = _round_up(B, 8)
    grid = (pl.cdiv(B, tb),)   # last block may be partial -> masked by Pallas

    # Pack each layer's weight and bias into one resident operand (out, in+1).
    p1 = jnp.concatenate([params["w1"], params["b1"][:, None]], axis=1)  # (16, 9)
    p2 = jnp.concatenate([params["w2"], params["b2"][:, None]], axis=1)  # (16, 17)
    p3 = jnp.concatenate([params["w3"], params["b3"][:, None]], axis=1)  # (4, 17)

    def resident(arr):
        # Full-array block, same block index every step -> stays VMEM-resident.
        return pl.BlockSpec(arr.shape, lambda i: (0, 0))

    return pl.pallas_call(
        _mlp_softmax_kernel,
        out_shape=jax.ShapeDtypeStruct((B, 4), jnp.float32),
        grid=grid,
        in_specs=[
            pl.BlockSpec((tb, 8), lambda i: (i, 0)),     # x, natural layout
            resident(p1), resident(p2), resident(p3),
        ],
        out_specs=pl.BlockSpec((tb, 4), lambda i: (i, 0)),
        compiler_params=pltpu.CompilerParams(
            dimension_semantics=("parallel",),
            vmem_limit_bytes=32 * 1024 * 1024,
        ),
    )(x, p1, p2, p3)


def _init_params(key):
    """Deterministic PyTorch-style (Kaiming-uniform-ish) init of the 3 Linears."""
    ks = jax.random.split(key, 6)

    def linear(kw, kb, fan_in, fan_out):
        bound = 1.0 / jnp.sqrt(fan_in)
        w = jax.random.uniform(kw, (fan_out, fan_in), jnp.float32, -bound, bound)
        b = jax.random.uniform(kb, (fan_out,), jnp.float32, -bound, bound)
        return w, b

    w1, b1 = linear(ks[0], ks[1], 8, 16)
    w2, b2 = linear(ks[2], ks[3], 16, 16)
    w3, b3 = linear(ks[4], ks[5], 16, 4)
    return {"w1": w1, "b1": b1, "w2": w2, "b2": b2, "w3": w3, "b3": b3}


def _reference(x, p):
    h = jnp.tanh(x @ p["w1"].T + p["b1"])
    h = jnp.tanh(h @ p["w2"].T + p["b2"])
    return jax.nn.softmax(h @ p["w3"].T + p["b3"], axis=-1)


if __name__ == "__main__":
    key = jax.random.PRNGKey(0)
    k_params, k_x1, k_x2 = jax.random.split(key, 3)
    params = _init_params(k_params)

    # Case 1: B=300, block_b=256 -> tb=256, grid=(2,), partial final block.
    x_big = jax.random.normal(k_x1, (300, 8), jnp.float32)
    out_big = jax.block_until_ready(
        policy_gradient_forward(x_big, params, block_b=256))
    ref_big = _reference(x_big, params)
    assert out_big.shape == (300, 4)
    assert jnp.allclose(out_big, ref_big, atol=2e-3, rtol=2e-3)
    assert jnp.allclose(jnp.sum(out_big, axis=-1), 1.0, atol=1e-3)

    # Case 2: tiny batch (B=8) with default tiling (single block).
    x_small = jax.random.normal(k_x2, (8, 8), jnp.float32)
    out_small = jax.block_until_ready(policy_gradient_forward(x_small, params))
    ref_small = _reference(x_small, params)
    assert out_small.shape == (8, 4)
    assert jnp.allclose(out_small, ref_small, atol=2e-3, rtol=2e-3)
    assert jnp.allclose(jnp.sum(out_small, axis=-1), 1.0, atol=1e-3)

    print("KERNEL_OK")
</pallas_src>

<mosaic_0001>
module attributes {stable_mosaic.version = 11 : i64} {
  func.func @_mlp_softmax_kernel(%arg0: i32, %arg1: memref<256x8xf32, #tpu.memory_space<vmem>>, %arg2: memref<16x9xf32, #tpu.memory_space<vmem>>, %arg3: memref<16x17xf32, #tpu.memory_space<vmem>>, %arg4: memref<4x17xf32, #tpu.memory_space<vmem>>, %arg5: memref<256x4xf32, #tpu.memory_space<vmem>>) attributes {dimension_semantics = [#tpu.dimension_semantics<parallel>], iteration_bounds = array<i64: 2>, scalar_prefetch = 0 : i64, scratch_operands = 0 : i64, tpu.core_type = #tpu.core_type<tc>, window_params = [{transform_indices = @transform_0, window_bounds = array<i64: 256, 8>}, {pipeline_mode = #tpu.pipeline_mode<synchronous>, transform_indices = @transform_1, window_bounds = array<i64: 16, 9>}, {pipeline_mode = #tpu.pipeline_mode<synchronous>, transform_indices = @transform_2, window_bounds = array<i64: 16, 17>}, {pipeline_mode = #tpu.pipeline_mode<synchronous>, transform_indices = @transform_3, window_bounds = array<i64: 4, 17>}, {transform_indices = @transform_4, window_bounds = array<i64: 256, 4>}]} {
    %c0 = arith.constant 0 : index
    %c0_0 = arith.constant 0 : index
    %0 = vector.load %arg1[%c0, %c0_0] : memref<256x8xf32, #tpu.memory_space<vmem>>, vector<256x8xf32>
    %cst = arith.constant 0.000000e+00 : f32
    %1 = vector.broadcast %cst : f32 to vector<256x120xf32>
    %2 = tpu.concatenate %0, %1 in 1 : vector<256x8xf32>, vector<256x120xf32> -> vector<256x128xf32>
    %3 = tpu.transpose %2, [1, 0] : vector<256x128xf32> -> vector<128x256xf32>
    %4 = vector.extract_strided_slice %3 {offsets = [0, 0], sizes = [8, 256], strides = [1, 1]} : vector<128x256xf32> to vector<8x256xf32>
    %c0_1 = arith.constant 0 : index
    %c0_2 = arith.constant 0 : index
    %5 = vector.load %arg2[%c0_1, %c0_2] : memref<16x9xf32, #tpu.memory_space<vmem>>, vector<16x8xf32>
    %c0_3 = arith.constant 0 : index
    %c8 = arith.constant 8 : index
    %6 = vector.load %arg2[%c0_3, %c8] : memref<16x9xf32, #tpu.memory_space<vmem>>, vector<16x1xf32>
    %c0_4 = arith.constant 0 : index
    %c0_5 = arith.constant 0 : index
    %7 = vector.load %arg3[%c0_4, %c0_5] : memref<16x17xf32, #tpu.memory_space<vmem>>, vector<16x16xf32>
    %c0_6 = arith.constant 0 : index
    %c16 = arith.constant 16 : index
    %8 = vector.load %arg3[%c0_6, %c16] : memref<16x17xf32, #tpu.memory_space<vmem>>, vector<16x1xf32>
    %c0_7 = arith.constant 0 : index
    %c0_8 = arith.constant 0 : index
    %9 = vector.load %arg4[%c0_7, %c0_8] : memref<4x17xf32, #tpu.memory_space<vmem>>, vector<4x16xf32>
    %c0_9 = arith.constant 0 : index
    %c16_10 = arith.constant 16 : index
    %10 = vector.load %arg4[%c0_9, %c16_10] : memref<4x17xf32, #tpu.memory_space<vmem>>, vector<4x1xf32>
    %cst_11 = arith.constant dense<0.000000e+00> : vector<16x256xf32>
    %11 = tpu.matmul %5, %4, %cst_11 {dimension_numbers = #tpu.dot_dimension_numbers<[1], [0], [0], [1], [0, 0, 1, 1], [], []>} : vector<16x8xf32>, vector<8x256xf32>, vector<16x256xf32> -> vector<16x256xf32>
    %12 = vector.broadcast %6 : vector<16x1xf32> to vector<16x256xf32>
    %13 = arith.addf %11, %12 : vector<16x256xf32>
    %14 = math.tanh %13 : vector<16x256xf32>
    %cst_12 = arith.constant dense<0.000000e+00> : vector<16x256xf32>
    %15 = tpu.matmul %7, %14, %cst_12 {dimension_numbers = #tpu.dot_dimension_numbers<[1], [0], [0], [1], [0, 0, 1, 1], [], []>} : vector<16x16xf32>, vector<16x256xf32>, vector<16x256xf32> -> vector<16x256xf32>
    %16 = vector.broadcast %8 : vector<16x1xf32> to vector<16x256xf32>
    %17 = arith.addf %15, %16 : vector<16x256xf32>
    %18 = math.tanh %17 : vector<16x256xf32>
    %cst_13 = arith.constant dense<0.000000e+00> : vector<4x256xf32>
    %19 = tpu.matmul %9, %18, %cst_13 {dimension_numbers = #tpu.dot_dimension_numbers<[1], [0], [0], [1], [0, 0, 1, 1], [], []>} : vector<4x16xf32>, vector<16x256xf32>, vector<4x256xf32> -> vector<4x256xf32>
    %20 = vector.broadcast %10 : vector<4x1xf32> to vector<4x256xf32>
    %21 = arith.addf %19, %20 : vector<4x256xf32>
    %cst_14 = arith.constant dense<0xFF800000> : vector<256xf32>
    %22 = vector.multi_reduction <maximumf>, %21, %cst_14 [0] : vector<4x256xf32> to vector<256xf32>
    %23 = vector.shape_cast %22 : vector<256xf32> to vector<1x256xf32>
    %24 = vector.broadcast %23 : vector<1x256xf32> to vector<4x256xf32>
    %25 = arith.subf %21, %24 : vector<4x256xf32>
    %26 = math.exp %25 : vector<4x256xf32>
    %cst_15 = arith.constant dense<0.000000e+00> : vector<256xf32>
    %27 = vector.multi_reduction <add>, %26, %cst_15 [0] : vector<4x256xf32> to vector<256xf32>
    %28 = vector.shape_cast %27 : vector<256xf32> to vector<1x256xf32>
    %29 = vector.broadcast %28 : vector<1x256xf32> to vector<4x256xf32>
    %30 = arith.divf %26, %29 : vector<4x256xf32>
    %cst_16 = arith.constant 0.000000e+00 : f32
    %31 = vector.broadcast %cst_16 : f32 to vector<4x256xf32>
    %32 = tpu.concatenate %30, %31 in 0 : vector<4x256xf32>, vector<4x256xf32> -> vector<8x256xf32>
    %33 = tpu.transpose %32, [1, 0] : vector<8x256xf32> -> vector<256x8xf32>
    %34 = vector.extract_strided_slice %33 {offsets = [0, 0], sizes = [256, 4], strides = [1, 1]} : vector<256x8xf32> to vector<256x4xf32>
    %c0_17 = arith.constant 0 : index
    %c0_18 = arith.constant 0 : index
    %35 = vector.load %arg5[%c0_17, %c0_18] : memref<256x4xf32, #tpu.memory_space<vmem>>, vector<256x4xf32>
    tpu.vector_store %arg5[%c0_17, %c0_18], %34 {strides = array<i32>} : memref<256x4xf32, #tpu.memory_space<vmem>>, vector<256x4xf32>,
    return
  }
  func.func @transform_0(%arg0: i32) -> (i32, i32) {
    %c0_i32 = arith.constant 0 : i32
    %c0_i32_0 = arith.constant 0 : i32
    return %arg0, %c0_i32 : i32, i32
  }
  func.func @transform_1(%arg0: i32) -> (i32, i32) {
    %c0_i32 = arith.constant 0 : i32
    %c0_i32_0 = arith.constant 0 : i32
    %c0_i32_1 = arith.constant 0 : i32
    return %c0_i32, %c0_i32_0 : i32, i32
  }
  func.func @transform_2(%arg0: i32) -> (i32, i32) {
    %c0_i32 = arith.constant 0 : i32
    %c0_i32_0 = arith.constant 0 : i32
    %c0_i32_1 = arith.constant 0 : i32
    return %c0_i32, %c0_i32_0 : i32, i32
  }
  func.func @transform_3(%arg0: i32) -> (i32, i32) {
    %c0_i32 = arith.constant 0 : i32
    %c0_i32_0 = arith.constant 0 : i32
    %c0_i32_1 = arith.constant 0 : i32
    return %c0_i32, %c0_i32_0 : i32, i32
  }
  func.func @transform_4(%arg0: i32) -> (i32, i32) {
    %c0_i32 = arith.constant 0 : i32
    %c0_i32_0 = arith.constant 0 : i32
    return %arg0, %c0_i32 : i32, i32
  }
}

</mosaic_0001>

<bundles_post_ra>
// kernel: policy_gradient_forward.1
= control target key start
LH: loop header
LB: loop body
LE: loop exit
PB: predicated region body
PF: predicated region fallthrough
CT: control target
= control target key end

     0   :  { %s1368_s15 = smov 0   ;;  %s1370_s16 = smov 0   ;;  %s1746_s0 = inlined_call_operand.vmem [shape: f32[300,8], index: 0, kind: input, shape index: {}]   ;;  %s1747_s1 = inlined_call_operand.vmem [shape: f32[16,9], index: 1, kind: input, shape index: {}]   ;;  %s1748_s2 = inlined_call_operand.vmem [shape: f32[16,17], index: 2, kind: input, shape index: {}]   ;;  %s1749_s3 = inlined_call_operand.vmem [shape: f32[4,17], index: 3, kind: input, shape index: {}]   ;;  %s1750_s4 = inlined_call_operand.vmem [shape: f32[300,4], index: 4, kind: output, shape index: {}]  }
   0x1   :  { %s1372_s17 = smov 0  }
   0x2 LB: > { %s1381_s18 = sadd.s32 4294967295, %s1307_s17   ;;  %s1383_s19 = sadd.s32 1, %s1307_s17   ;;  %s1307_s17 = sphi %s1372_s17, %s1759_s17   ;;  %s1303_s16 = sphi %s1370_s16, %s1758_s16   ;;  %s1299_s15 = sphi %s1368_s15, %s1757_s15  }
   0x3   : > { %s107_s20 = ssub.s32 %s1307_s17, %s1383_s19  ;;  %s110_s21 = sadd.s32 1, %s1303_s16 }
   0x4   : > { %p108_p0 = scmp.eq.s32.totalorder %s107_s20, 0  ;;  %p120_p1 = scmp.ne.s32.totalorder %s1303_s16, %s1299_s15 }
   0x5   : > { %p121_p2 = scmp.eq.s32.totalorder %s1381_s18, 1  ;;  %p1068_p3 = scmp.ge.s32.totalorder %s1307_s17, 1 }
   0x6   : > { %s1391_s22 = scalar_select %p108_p0, %s1303_s16, %s110_s21  }
   0x7   : > { %p1393_p4 = por %p121_p2, %p120_p1  ;;  %p171_p5 = scmp.lt.s32.totalorder %s1307_s17, 3 }
   0x9   : > { %p172_p6 = pnand %p1068_p3, %p171_p5 }
   0xa   : > { %s1398_s24 = sshll.u32 (!%p172_p6), %s1381_s18, 5  ;;  %s197_s14 = sand.u32 (!%p172_p6), 1, %s1299_s15  }
   0xb   : > { %175 = sbr.rel (%p172_p6) target bundleno = 925 (0x39d), region = 36  ;;  %p205_p7 = scmp.lt.s32.totalorder (!%p172_p6), %s1398_s24, 37 }
   0xc   : > { %s1069_s17 = sshll.u32 (!%p172_p6), %s197_s14, 8 }
   0xd   : > { %s1538_s20 = scalar_lea.vmem (!%p172_p6), [#allocation2], %s1069_s17  }
  0x10   : > { %s206_s25 = scalar_select %p205_p7, %s1398_s24, 37  ;;  %vm251_vm0 = vcmask 64512   ;;  %v285_v38 = vld [vmem:[%s1747_s1 + $0x8] sm:$0xff]  ;;  %v1341_v41 = vmov 8   ;;  %v284_v50 = vld [vmem:[%s1747_s1] sm:$0xff]  ;;  %vm459_vm1 = vcmask 130048  }
  0x11   : > { %1225 = vset.pattern.permute.xlu0 %v1341_v41  ;;  %vm561_vm2 = vcmask 1043456   ;;  %vm692_vm11 = vcmask 31744   ;;  %s733_s15 = ssub.s32 (%p1393_p4), 38, %s1398_s24  ;;  %s1131_s21 = sshll.u32 (%p1393_p4), %s1381_s18, 8 }
  0x12   : > { %s1071_s26 = sshll.u32 %s206_s25, 3  ;;  %296 = vperm.xlu0 %1225, %v285_v38   ;;  %p734_p8 = scmp.lt.s32.totalorder (%p1393_p4), %s733_s15, 32 }
  0x13   : > { %s1405_s29 = scalar_lea.vmem %s1746_s0, %s1071_s26  ;;  %s1611_s27 = scalar_lea.vmem (%p1393_p4), %s1750_s4, %s1131_s21  }
  0x14   : > { %v234_v0 = vld [vmem:[%s1405_s29 + $0x78] sm:$0xff]  ;;  %v233_v2 = vld [vmem:[%s1405_s29 + $0x70] sm:$0xff]  ;;  %v232_v8 = vld [vmem:[%s1405_s29 + $0x68] sm:$0xff] }
  0x15   : > { %v250_v1 = vld [vmem:[%s1405_s29 + $0xf8] sm:$0xff]  ;;  %v267_v3 = vsel %vm251_vm0, %v234_v0, 0.0  ;;  %v249_v5 = vld [vmem:[%s1405_s29 + $0xf0] sm:$0xff]  ;;  %v266_v6 = vsel %vm251_vm0, %v233_v2, 0.0  ;;  %v248_v9 = vld [vmem:[%s1405_s29 + $0xe8] sm:$0xff]  ;;  %v265_v10 = vsel %vm251_vm0, %v232_v8, 0.0 }
  0x16   : > { %v283_v4 = vsel %vm251_vm0, %v250_v1, 0.0  ;;  %1072 = vmatpush.xpose.msk.msra.mxu0 %vm251_vm0, %v267_v3  ;;  %v282_v7 = vsel %vm251_vm0, %v249_v5, 0.0  ;;  %v281_v11 = vsel %vm251_vm0, %v248_v9, 0.0  ;;  %v231_v12 = vld [vmem:[%s1405_s29 + $0x60] sm:$0xff]  ;;  %v230_v16 = vld [vmem:[%s1405_s29 + $0x58] sm:$0xff]  ;;  %v229_v20 = vld [vmem:[%s1405_s29 + $0x50] sm:$0xff] }
  0x17   : > { %1090 = vmatpush.xpose.msk.msra.mxu1 %vm251_vm0, %v283_v4  ;;  %v247_v13 = vld [vmem:[%s1405_s29 + $0xe0] sm:$0xff]  ;;  %v264_v14 = vsel %vm251_vm0, %v231_v12, 0.0  ;;  %v246_v17 = vld [vmem:[%s1405_s29 + $0xd8] sm:$0xff]  ;;  %v263_v18 = vsel %vm251_vm0, %v230_v16, 0.0  ;;  %v245_v21 = vld [vmem:[%s1405_s29 + $0xd0] sm:$0xff]  ;;  %v262_v22 = vsel %vm251_vm0, %v229_v20, 0.0 }
  0x18   : > { %v280_v15 = vsel %vm251_vm0, %v247_v13, 0.0  ;;  %v279_v19 = vsel %vm251_vm0, %v246_v17, 0.0  ;;  %v278_v23 = vsel %vm251_vm0, %v245_v21, 0.0  ;;  %v228_v24 = vld [vmem:[%s1405_s29 + $0x48] sm:$0xff]  ;;  %v227_v28 = vld [vmem:[%s1405_s29 + $0x40] sm:$0xff]  ;;  %v226_v32 = vld [vmem:[%s1405_s29 + $0x38] sm:$0xff] }
  0x19   : > { %v244_v25 = vld [vmem:[%s1405_s29 + $0xc8] sm:$0xff]  ;;  %v261_v26 = vsel %vm251_vm0, %v228_v24, 0.0  ;;  %v243_v29 = vld [vmem:[%s1405_s29 + $0xc0] sm:$0xff]  ;;  %v260_v30 = vsel %vm251_vm0, %v227_v28, 0.0  ;;  %v242_v33 = vld [vmem:[%s1405_s29 + $0xb8] sm:$0xff]  ;;  %v259_v34 = vsel %vm251_vm0, %v226_v32, 0.0 }
  0x1a   : > { %1073 = vmatpush.xpose.msk.msra.mxu0 %vm251_vm0, %v266_v6  ;;  %v277_v27 = vsel %vm251_vm0, %v244_v25, 0.0  ;;  %v276_v31 = vsel %vm251_vm0, %v243_v29, 0.0  ;;  %v275_v35 = vsel %vm251_vm0, %v242_v33, 0.0  ;;  %v225_v36 = vld [vmem:[%s1405_s29 + $0x30] sm:$0xff]  ;;  %v224_v42 = vld [vmem:[%s1405_s29 + $0x28] sm:$0xff]  ;;  %v223_v46 = vld [vmem:[%s1405_s29 + $0x20] sm:$0xff]  ;;  %291 = vperm.xlu0 %1225, %v284_v50  }
  0x1b   : > { %1091 = vmatpush.xpose.msk.msra.mxu1 %vm251_vm0, %v282_v7  ;;  %v241_v37 = vld [vmem:[%s1405_s29 + $0xb0] sm:$0xff]  ;;  %v258_v39 = vsel %vm251_vm0, %v225_v36, 0.0  ;;  %v240_v43 = vld [vmem:[%s1405_s29 + $0xa8] sm:$0xff]  ;;  %v257_v44 = vsel %vm251_vm0, %v224_v42, 0.0  ;;  %v239_v47 = vld [vmem:[%s1405_s29 + $0xa0] sm:$0xff]  ;;  %v256_v48 = vsel %vm251_vm0, %v223_v46, 0.0 }
  0x1c   : > { %v274_v40 = vsel %vm251_vm0, %v241_v37, 0.0  ;;  %v273_v45 = vsel %vm251_vm0, %v240_v43, 0.0  ;;  %v272_v49 = vsel %vm251_vm0, %v239_v47, 0.0  ;;  %v222_v51 = vld [vmem:[%s1405_s29 + $0x18] sm:$0xff]  ;;  %v221_v55 = vld [vmem:[%s1405_s29 + $0x10] sm:$0xff]  ;;  %v220_v59 = vld [vmem:[%s1405_s29 + $0x8] sm:$0xff] }
  0x1d   : > { %v238_v52 = vld [vmem:[%s1405_s29 + $0x98] sm:$0xff]  ;;  %v255_v53 = vsel %vm251_vm0, %v222_v51, 0.0  ;;  %v237_v56 = vld [vmem:[%s1405_s29 + $0x90] sm:$0xff]  ;;  %v254_v57 = vsel %vm251_vm0, %v221_v55, 0.0  ;;  %v236_v60 = vld [vmem:[%s1405_s29 + $0x88] sm:$0xff]  ;;  %v253_v61 = vsel %vm251_vm0, %v220_v59, 0.0 }
  0x1e   : > { %1074 = vmatpush.xpose.msk.msra.mxu0 %vm251_vm0, %v265_v10  ;;  %v271_v54 = vsel %vm251_vm0, %v238_v52, 0.0  ;;  %v270_v58 = vsel %vm251_vm0, %v237_v56, 0.0  ;;  %v269_v62 = vsel %vm251_vm0, %v236_v60, 0.0  ;;  %v219_v63 = vld [vmem:[%s1405_s29] sm:$0xff]  ;;  %v287_v3 = vld [vmem:[%s1748_s2 + $0x8] sm:$0xff]  ;;  %v1342_v4 = vmov 16  }
  0x1f   : > { %1092 = vmatpush.xpose.msk.msra.mxu1 %vm251_vm0, %v281_v11  ;;  %v235_v0 = vld [vmem:[%s1405_s29 + $0x80] sm:$0xff]  ;;  %v252_v1 = vsel %vm251_vm0, %v219_v63, 0.0  ;;  %1226 = vset.pattern.permute.xlu1 %v1342_v4 }
  0x20   : > { %v268_v2 = vsel %vm251_vm0, %v235_v0, 0.0  ;;  %1227 = vset.pattern.permute.xlu2 %v1342_v4  ;;  %456 = vperm.xlu1 %1226, %v287_v3   ;;  %v286_v6 = vld [vmem:[%s1748_s2] sm:$0xff] }
  0x21   : > { %v288_v20 = vld [vmem:[%s1749_s3] sm:$0xf] }
  0x22   : > { %1075 = vmatpush.xpose.msk.msra.mxu0 %vm251_vm0, %v264_v14  ;;  %516 = vperm.xlu2 %1227, %v288_v20  }
  0x23   : > { %1093 = vmatpush.xpose.msk.msra.mxu1 %vm251_vm0, %v280_v15 }
  0x26   : > { %1076 = vmatpush.xpose.msk.msra.mxu0 %vm251_vm0, %v263_v18 }
  0x27   : > { %1094 = vmatpush.xpose.msk.msra.mxu1 %vm251_vm0, %v279_v19 }
  0x28   : > { %451 = vperm.xlu1 %1226, %v286_v6  }
  0x2a   : > { %1077 = vmatpush.xpose.msk.msra.mxu0 %vm251_vm0, %v262_v22 }
  0x2b   : > { %1095 = vmatpush.xpose.msk.msra.mxu1 %vm251_vm0, %v278_v23 }
  0x2e   : > { %1078 = vmatpush.xpose.msk.msra.mxu0 %vm251_vm0, %v261_v26 }
  0x2f   : > { %1096 = vmatpush.xpose.msk.msra.mxu1 %vm251_vm0, %v277_v27 }
  0x32   : > { %1079 = vmatpush.xpose.msk.msra.mxu0 %vm251_vm0, %v260_v30 }
  0x33   : > { %1097 = vmatpush.xpose.msk.msra.mxu1 %vm251_vm0, %v276_v31 }
  0x36   : > { %1080 = vmatpush.xpose.msk.msra.mxu0 %vm251_vm0, %v259_v34 }
  0x37   : > { %1098 = vmatpush.xpose.msk.msra.mxu1 %vm251_vm0, %v275_v35 }
  0x3a   : > { %1081 = vmatpush.xpose.msk.msra.mxu0 %vm251_vm0, %v258_v39 }
  0x3b   : > { %1099 = vmatpush.xpose.msk.msra.mxu1 %vm251_vm0, %v274_v40 }
  0x3e   : > { %1082 = vmatpush.xpose.msk.msra.mxu0 %vm251_vm0, %v257_v44 }
  0x3f   : > { %1100 = vmatpush.xpose.msk.msra.mxu1 %vm251_vm0, %v273_v45 }
  0x42   : > { %1083 = vmatpush.xpose.msk.msra.mxu0 %vm251_vm0, %v256_v48 }
  0x43   : > { %1101 = vmatpush.xpose.msk.msra.mxu1 %vm251_vm0, %v272_v49 }
  0x46   : > { %1084 = vmatpush.xpose.msk.msra.mxu0 %vm251_vm0, %v255_v53 }
  0x47   : > { %1102 = vmatpush.xpose.msk.msra.mxu1 %vm251_vm0, %v271_v54 }
  0x4a   : > { %1085 = vmatpush.xpose.msk.msra.mxu0 %vm251_vm0, %v254_v57 }
  0x4b   : > { %1103 = vmatpush.xpose.msk.msra.mxu1 %vm251_vm0, %v270_v58 }
  0x4e   : > { %1086 = vmatpush.xpose.msk.msra.mxu0 %vm251_vm0, %v253_v61 }
  0x4f   : > { %1104 = vmatpush.xpose.msk.msra.mxu1 %vm251_vm0, %v269_v62 }
  0x52   : > { %1087 = vmatpush.xpose.msk.msra.mxu0 %vm251_vm0, %v252_v1 }
  0x53   : > { %1105 = vmatpush.xpose.msk.msra.mxu1 %vm251_vm0, %v268_v2 }
  0x55   : > { %1088 = vmatmul.msk.f32.vlgmr.msra.gmra.mxu0 %vm251_vm0, %v284_v50 }
  0x56   : > { %1106 = vmatmul.msk.f32.vlgmr.msra.gmra.mxu1 %vm251_vm0, %v284_v50 }
  0x5d   : > { %1089 = vmatmul.msk.f32.gmra.mxu0 %vm251_vm0, %v285_v38 }
  0x5e   : > { %1107 = vmatmul.msk.f32.gmra.mxu1 %vm251_vm0, %v285_v38 }
  0x7c   : > { %v517_v35 = vpop.permute.xlu2 %516 }
  0x84   : > { %v297_v5 = vpop.permute.xlu0 %296 }
  0x8c   : > { %v292_v9 = vpop.permute.xlu0 %291 }
  0x92   : > { %v457_v21 = vpop.permute.xlu1 %456 }
  0x9a   : > { %v452_v24 = vpop.permute.xlu1 %451 }
  0xd2   : > { %v416_v7 = vpop.f32.mrf.mxu0 }
  0xd3   : > { %v439_v8 = vpop.f32.mrf.mxu1  ;;  %v417_v12 = vadd.f32 %v416_v7, %v292_v9 }
  0xd4   : > { %v440_v15 = vadd.f32 %v439_v8, %v292_v9 }
  0xda   : > { %v419_v10 = vpop.f32.mrf.mxu0 }
  0xdb   : > { %v442_v11 = vpop.f32.mrf.mxu1  ;;  %v420_v13 = vadd.f32 %v419_v10, %v297_v5 }
  0xdc   : > { %v443_v14 = vadd.f32 %v442_v11, %v297_v5 }
  0xdd   : > { %1229 = vtanh.f32 %v420_v13 }
  0xde   : > { %1231 = vtanh.f32 %v443_v14 }
  0xdf   : > { %1233 = vtanh.f32 %v417_v12 }
  0xe0   : > { %1235 = vtanh.f32 %v440_v15 }
  0xe3   : > { %v1230_v16 = vpop.eup %1229 }
  0xe4   : > { %v1232_v17 = vpop.eup %1231  ;;  %478 = vmatpush.msra.mxu2 %v1230_v16 }
  0xe5   : > { %v1234_v18 = vpop.eup %1233  ;;  %501 = vmatpush.msra.mxu3 %v1232_v17 }
  0xe6   : > { %v1236_v19 = vpop.eup %1235  ;;  %479 = vmatpush.msra.mxu2 %v1234_v18 }
  0xe7   : > { %502 = vmatpush.msra.mxu3 %v1236_v19  ;;  %1108 = vmatmul.msk.f32.vlgmr.msra.gmra.mxu2 %vm459_vm1, %v286_v6 }
  0xe8   : > { %1110 = vmatmul.msk.f32.vlgmr.msra.gmra.mxu3 %vm459_vm1, %v286_v6 }
  0xef   : > { %1109 = vmatmul.msk.f32.gmra.mxu2 %vm459_vm1, %v287_v3 }
  0xf0   : > { %1111 = vmatmul.msk.f32.gmra.mxu3 %vm459_vm1, %v287_v3 }
 0x16a   : > { %v481_v22 = vpop.f32.mrf.mxu2 }
 0x16b   : > { %v504_v23 = vpop.f32.mrf.mxu3  ;;  %v482_v26 = vadd.f32 %v481_v22, %v452_v24 }
 0x16c   : > { %v505_v29 = vadd.f32 %v504_v23, %v452_v24 }
 0x172   : > { %v484_v25 = vpop.f32.mrf.mxu2 }
 0x173   : > { %v485_v27 = vadd.f32 %v484_v25, %v457_v21  ;;  %v507_v28 = vpop.f32.mrf.mxu3 }
 0x174   : > { %v508_v30 = vadd.f32 %v507_v28, %v457_v21 }
 0x175   : > { %1237 = vtanh.f32 %v485_v27 }
 0x176   : > { %1239 = vtanh.f32 %v508_v30 }
 0x177   : > { %1241 = vtanh.f32 %v482_v26 }
 0x178   : > { %1243 = vtanh.f32 %v505_v29 }
 0x17b   : > { %v1238_v31 = vpop.eup %1237 }
 0x17c   : > { %v1240_v32 = vpop.eup %1239  ;;  %535 = vmatpush.msrb.mxu2 %v1238_v31 }
 0x17d   : > { %v1242_v33 = vpop.eup %1241  ;;  %555 = vmatpush.msrb.mxu3 %v1240_v32 }
 0x17e   : > { %v1244_v34 = vpop.eup %1243  ;;  %536 = vmatpush.msrb.mxu2 %v1242_v33 }
 0x17f   : > { %556 = vmatpush.msrb.mxu3 %v1244_v34  ;;  %1112 = vmatmul.msk.f32.vlgmr.msrb.gmra.mxu2 %vm459_vm1, %v288_v20 }
 0x180   : > { %1113 = vmatmul.msk.f32.vlgmr.msrb.gmra.mxu3 %vm459_vm1, %v288_v20 }
 0x202   : > { %v538_v36 = vpop.f32.mrf.mxu2 }
 0x203   : > { %v539_v37 = vadd.f32 %v538_v36, %v517_v35  ;;  %v558_v38 = vpop.f32.mrf.mxu3 }
 0x204   : > { %v559_v39 = vadd.f32 %v558_v38, %v517_v35 }
 0x205   : > { %v562_v40 = vsel %vm561_vm2, %v539_v37, -inf }
 0x206   : > { %v563_v41 = vrot.slane %v562_v40, 4  ;;  %v569_v42 = vsel %vm561_vm2, %v559_v39, -inf }
 0x207   : > { %v570_v43 = vrot.slane %v569_v42, 4 }
 0x208   : > { %v564_v44 = vmax.f32 %v562_v40, %v563_v41 }
 0x209   : > { %v571_v45 = vmax.f32 %v569_v42, %v570_v43 }
 0x20a   : > { %v565_v46 = vrot.slane %v564_v44, 2 }
 0x20b   : > { %v572_v47 = vrot.slane %v571_v45, 2 }
 0x20c   : > { %v566_v48 = vmax.f32 %v564_v44, %v565_v46 }
 0x20d   : > { %v573_v49 = vmax.f32 %v571_v45, %v572_v47 }
 0x20e   : > { %v567_v50 = vrot.slane %v566_v48, 1 }
 0x20f   : > { %v574_v51 = vrot.slane %v573_v49, 1 }
 0x210   : > { %v568_v52 = vmax.f32 %v566_v48, %v567_v50 }
 0x211   : > { %v575_v53 = vmax.f32 %v573_v49, %v574_v51 }
 0x212   : > { %v576_v54 = vsub.f32 %v539_v37, %v568_v52 }
 0x213   : > { %v577_v55 = vsub.f32 %v559_v39, %v575_v53 }
 0x214   : > { %v578_v56 = vmul.f32 1.442695, %v576_v54 }
 0x215   : > { %v580_v57 = vmul.f32 1.442695, %v577_v55 }
 0x216   : > { %1245 = vpow2.f32 %v578_v56 }
 0x217   : > { %1247 = vpow2.f32 %v580_v57 }
 0x21c   : > { %v1246_v58 = vpop.eup %1245 }
 0x21d   : > { %v1248_v59 = vpop.eup %1247  ;;  %v582_v60 = vsel %vm561_vm2, %v1246_v58, 0.0 }
 0x21e   : > { %v583_v61 = vrot.slane %v582_v60, 4  ;;  %v589_v62 = vsel %vm561_vm2, %v1248_v59, 0.0 }
 0x21f   : > { %v590_v63 = vrot.slane %v589_v62, 4 }
 0x220   : > { %v584_v0 = vadd.f32 %v583_v61, %v582_v60 }
 0x221   : > { %v591_v1 = vadd.f32 %v590_v63, %v589_v62 }
 0x222   : > { %v585_v2 = vrot.slane %v584_v0, 2 }
 0x223   : > { %v592_v3 = vrot.slane %v591_v1, 2 }
 0x224   : > { %v586_v5 = vadd.f32 %v585_v2, %v584_v0 }
 0x225   : > { %v593_v6 = vadd.f32 %v592_v3, %v591_v1 }
 0x226   : > { %v587_v7 = vrot.slane %v586_v5, 1 }
 0x227   : > { %v594_v8 = vrot.slane %v593_v6, 1 }
 0x228   : > { %v588_v9 = vadd.f32 %v587_v7, %v586_v5 }
 0x229   : > { %v595_v10 = vadd.f32 %v594_v8, %v593_v6 }
 0x22a   : > { %1249 = vrcp.f32 %v588_v9  ;;  %v607_v17 = vand.u32 2147483648, %v588_v9  ;;  %v605_v20 = vand.u32 2147483647, %v588_v9  ;;  %vm601_vm5 = vweird.f32 %v588_v9 }
 0x22b   : > { %1251 = vrcp.f32 %v595_v10  ;;  %v622_v18 = vand.u32 2147483648, %v595_v10  ;;  %v620_v22 = vand.u32 2147483647, %v595_v10  ;;  %vm616_vm6 = vweird.f32 %v595_v10 }
 0x22c   : > { %v608_v25 = vor.u32 1.1754944e-38, %v607_v17  ;;  %vm606_vm9 = vcmp.eq.f32.partialorder %v605_v20, 8.507059e+37 }
 0x22d   : > { %v623_v26 = vor.u32 1.1754944e-38, %v622_v18  ;;  %vm621_vm10 = vcmp.eq.f32.partialorder %v620_v22, 8.507059e+37 }
 0x230   : > { %v1250_v11 = vpop.eup %1249 }
 0x231   : > { %v1252_v12 = vpop.eup %1251  ;;  %v597_v13 = vmul.f32 %v1250_v11, %v588_v9  ;;  %vm602_vm3 = vweird.f32 %v1250_v11 }
 0x232   : > { %v612_v14 = vmul.f32 %v1252_v12, %v595_v10  ;;  %vm617_vm4 = vweird.f32 %v1252_v12  ;;  %vm603_vm7 = vmor %vm601_vm5, %vm602_vm3 }
 0x233   : > { %v598_v15 = vsub.f32 1.0, %v597_v13  ;;  %vm618_vm8 = vmor %vm616_vm6, %vm617_vm4 }
 0x234   : > { %v613_v16 = vsub.f32 1.0, %v612_v14 }
 0x235   : > { %v599_v19 = vmul.f32 %v1250_v11, %v598_v15 }
 0x236   : > { %v614_v21 = vmul.f32 %v1252_v12, %v613_v16 }
 0x237   : > { %v600_v23 = vadd.f32 %v1250_v11, %v599_v19 }
 0x238   : > { %v615_v24 = vadd.f32 %v1252_v12, %v614_v21 }
 0x239   : > { %v604_v27 = vsel %vm603_vm7, %v1250_v11, %v600_v23 }
 0x23a   : > { %v619_v28 = vsel %vm618_vm8, %v1252_v12, %v615_v24  ;;  %v609_v29 = vsel %vm606_vm9, %v608_v25, %v604_v27 }
 0x23b   : > { %v624_v30 = vsel %vm621_vm10, %v623_v26, %v619_v28  ;;  %v610_v31 = vmul.f32 %v1246_v58, %v609_v29 }
 0x23c   : > { %v625_v32 = vmul.f32 %v1248_v59, %v624_v30 }
 0x23d   : > { %v626_v33 = vsel %vm561_vm2, %v610_v31, 0.0 }
 0x23e   : > { %v627_v34 = vsel %vm561_vm2, %v625_v32, 0.0  ;;  %628 = vxpose.xlu2.b32.start.end [1/1] (short) %v626_v33, 128 }
 0x23f   : > { %660 = vxpose.xlu0.b32.start.end [1/1] (short) %v627_v34, 128 }
 0x2a6   : > { %1228 = vset.pattern.permute.xlu0 %v1342_v4 }
 0x2d7   : > { %v644_v35 = vpop.trf.xlu2 }
 0x2d8   : > { %693 = vst.msk [vmem:[%s1538_s20] sm:$0xff] %vm692_vm11, %v644_v35 }
 0x2df   : > { %v645_v36 = vpop.trf.xlu2 }
 0x2e0   : > { %694 = vst.msk [vmem:[%s1538_s20 + $0x8] sm:$0xff] %vm692_vm11, %v645_v36 }
 0x2e3   : > { %v676_v4 = vpop.trf.xlu0 }
 0x2e4   : > { %709 = vst.msk [vmem:[%s1538_s20 + $0x80] sm:$0xff] %vm692_vm11, %v676_v4 }
 0x2e7   : > { %v646_v37 = vpop.trf.xlu2 }
 0x2e8   : > { %695 = vst.msk [vmem:[%s1538_s20 + $0x10] sm:$0xff] %vm692_vm11, %v646_v37 }
 0x2eb   : > { %v677_v38 = vpop.trf.xlu0 }
 0x2ec   : > { %710 = vst.msk [vmem:[%s1538_s20 + $0x88] sm:$0xff] %vm692_vm11, %v677_v38 }
 0x2ef   : > { %v647_v39 = vpop.trf.xlu2 }
 0x2f0   : > { %696 = vst.msk [vmem:[%s1538_s20 + $0x18] sm:$0xff] %vm692_vm11, %v647_v39 }
 0x2f3   : > { %v678_v40 = vpop.trf.xlu0 }
 0x2f4   : > { %711 = vst.msk [vmem:[%s1538_s20 + $0x90] sm:$0xff] %vm692_vm11, %v678_v40 }
 0x2f7   : > { %v648_v41 = vpop.trf.xlu2 }
 0x2f8   : > { %697 = vst.msk [vmem:[%s1538_s20 + $0x20] sm:$0xff] %vm692_vm11, %v648_v41 }
 0x2fb   : > { %v679_v42 = vpop.trf.xlu0 }
 0x2fc   : > { %712 = vst.msk [vmem:[%s1538_s20 + $0x98] sm:$0xff] %vm692_vm11, %v679_v42 }
 0x2ff   : > { %v649_v43 = vpop.trf.xlu2 }
 0x300   : > { %698 = vst.msk [vmem:[%s1538_s20 + $0x28] sm:$0xff] %vm692_vm11, %v649_v43 }
 0x303   : > { %v680_v44 = vpop.trf.xlu0 }
 0x304   : > { %713 = vst.msk [vmem:[%s1538_s20 + $0xa0] sm:$0xff] %vm692_vm11, %v680_v44 }
 0x307   : > { %v650_v45 = vpop.trf.xlu2 }
 0x308   : > { %699 = vst.msk [vmem:[%s1538_s20 + $0x30] sm:$0xff] %vm692_vm11, %v650_v45 }
 0x30b   : > { %v681_v46 = vpop.trf.xlu0 }
 0x30c   : > { %714 = vst.msk [vmem:[%s1538_s20 + $0xa8] sm:$0xff] %vm692_vm11, %v681_v46 }
 0x30f   : > { %v651_v47 = vpop.trf.xlu2 }
 0x310   : > { %700 = vst.msk [vmem:[%s1538_s20 + $0x38] sm:$0xff] %vm692_vm11, %v651_v47 }
 0x313   : > { %v682_v48 = vpop.trf.xlu0 }
 0x314   : > { %715 = vst.msk [vmem:[%s1538_s20 + $0xb0] sm:$0xff] %vm692_vm11, %v682_v48 }
 0x317   : > { %v652_v49 = vpop.trf.xlu2 }
 0x318   : > { %701 = vst.msk [vmem:[%s1538_s20 + $0x40] sm:$0xff] %vm692_vm11, %v652_v49 }
 0x31b   : > { %v683_v50 = vpop.trf.xlu0 }
 0x31c   : > { %716 = vst.msk [vmem:[%s1538_s20 + $0xb8] sm:$0xff] %vm692_vm11, %v683_v50 }
 0x31f   : > { %v653_v51 = vpop.trf.xlu2 }
 0x320   : > { %702 = vst.msk [vmem:[%s1538_s20 + $0x48] sm:$0xff] %vm692_vm11, %v653_v51 }
 0x323   : > { %v684_v52 = vpop.trf.xlu0 }
 0x324   : > { %717 = vst.msk [vmem:[%s1538_s20 + $0xc0] sm:$0xff] %vm692_vm11, %v684_v52 }
 0x327   : > { %v654_v53 = vpop.trf.xlu2 }
 0x328   : > { %703 = vst.msk [vmem:[%s1538_s20 + $0x50] sm:$0xff] %vm692_vm11, %v654_v53 }
 0x32b   : > { %v685_v54 = vpop.trf.xlu0 }
 0x32c   : > { %718 = vst.msk [vmem:[%s1538_s20 + $0xc8] sm:$0xff] %vm692_vm11, %v685_v54 }
 0x32f   : > { %v655_v55 = vpop.trf.xlu2 }
 0x330   : > { %704 = vst.msk [vmem:[%s1538_s20 + $0x58] sm:$0xff] %vm692_vm11, %v655_v55 }
 0x333   : > { %v686_v56 = vpop.trf.xlu0 }
 0x334   : > { %719 = vst.msk [vmem:[%s1538_s20 + $0xd0] sm:$0xff] %vm692_vm11, %v686_v56 }
 0x337   : > { %v656_v57 = vpop.trf.xlu2 }
 0x338   : > { %705 = vst.msk [vmem:[%s1538_s20 + $0x60] sm:$0xff] %vm692_vm11, %v656_v57 }
 0x33b   : > { %v687_v58 = vpop.trf.xlu0 }
 0x33c   : > { %720 = vst.msk [vmem:[%s1538_s20 + $0xd8] sm:$0xff] %vm692_vm11, %v687_v58 }
 0x33f   : > { %v657_v59 = vpop.trf.xlu2 }
 0x340   : > { %706 = vst.msk [vmem:[%s1538_s20 + $0x68] sm:$0xff] %vm692_vm11, %v657_v59 }
 0x343   : > { %v688_v60 = vpop.trf.xlu0 }
 0x344   : > { %721 = vst.msk [vmem:[%s1538_s20 + $0xe0] sm:$0xff] %vm692_vm11, %v688_v60 }
 0x347   : > { %v658_v61 = vpop.trf.xlu2 }
 0x348   : > { %707 = vst.msk [vmem:[%s1538_s20 + $0x70] sm:$0xff] %vm692_vm11, %v658_v61 }
 0x34b   : > { %v689_v62 = vpop.trf.xlu0 }
 0x34c   : > { %722 = vst.msk [vmem:[%s1538_s20 + $0xe8] sm:$0xff] %vm692_vm11, %v689_v62 }
 0x34f   : > { %v659_v63 = vpop.trf.xlu2 }
 0x350   : > { %708 = vst.msk [vmem:[%s1538_s20 + $0x78] sm:$0xff] %vm692_vm11, %v659_v63 }
 0x353   : > { %v690_v0 = vpop.trf.xlu0 }
 0x354   : > { %723 = vst.msk [vmem:[%s1538_s20 + $0xf0] sm:$0xff] %vm692_vm11, %v690_v0 }
 0x358   : > { %731 = sbr.rel (!%p1393_p4) target bundleno = 925 (0x39d), region = 40 }
 0x35b   : > { %v691_v1 = vpop.trf.xlu0 }
 0x35c   : > { %724 = vst.msk [vmem:[%s1538_s20 + $0xf8] sm:$0xff] %vm692_vm11, %v691_v1 }
 0x35d   : > { %s1761_s15 = smov (!%p734_p8, %s733_s15), 32 }
 0x35e   : > { %s1116_s28 = sshll.u32 %s1761_s15, 3 }
 0x35f   : > { %p1119_p9 = scmp.eq.s32.totalorder %s1116_s28, 0 }
 0x360   : > { %s1617_s29 = sshrl.u32 (!%p1119_p9), %s1761_s15, 5 }
 0x361   : > { %742 = sbr.rel (%p1119_p9) target bundleno = 925 (0x39d), region = 44  ;;  %p1120_p10 = scmp.le.s32.totalorder (!%p1119_p9), %s1617_s29, 0 }
 0x366   : > { %1021 = sbr.rel (%p1120_p10) target bundleno = 908 (0x38c), region = 120  ;;  %s1752_s18 = smov (!%p1120_p10), %s1611_s27 }
 0x367   : > { %s1753_s23 = smov (!%p1120_p10), %s1538_s20  ;;  %s1626_s24 = smov (!%p1120_p10), 0  }
 0x368   : > { %s1628_s30 = smov (!%p1120_p10), 0  }
 0x36b LB: >> { %v867_v2 = vld [vmem:[%s1315_s23] sm:$0xff]  ;;  %v869_v3 = vld [vmem:[%s1315_s23 + $0x8] sm:$0xff]  ;;  %v871_v5 = vld [vmem:[%s1315_s23 + $0x10] sm:$0xff]  ;;  %s931_s5 = sadd.s32 1, %s1319_s24  ;;  %s861_s30 = sadd.s32 1, %s1323_s30   ;;  %s1323_s30 = sphi %s1628_s30, %s861_s30   ;;  %s1319_s24 = sphi %s1626_s24, %s1756_s24   ;;  %s1315_s23 = sphi %s1753_s23, %s1755_s23   ;;  %s1311_s18 = sphi %s1752_s18, %s1754_s18  }
 0x36c   : >> { %868 = vst [vmem:[%s1311_s18] sm:$0xff] %v867_v2  ;;  %v873_v6 = vld [vmem:[%s1315_s23 + $0x18] sm:$0xff]  ;;  %p932_p11 = scmp.ge.s32.totalorder %s931_s5, %s1617_s29  ;;  %v875_v7 = vld [vmem:[%s1315_s23 + $0x20] sm:$0xff]  ;;  %v877_v8 = vld [vmem:[%s1315_s23 + $0x28] sm:$0xff]  ;;  %p860_p12 = scmp.ge.s32.totalorder %s861_s30, %s1617_s29 }
 0x36d   : >> { %870 = vst [vmem:[%s1311_s18 + $0x8] sm:$0xff] %v869_v3  ;;  %v879_v9 = vld [vmem:[%s1315_s23 + $0x30] sm:$0xff]  ;;  %v881_v10 = vld [vmem:[%s1315_s23 + $0x38] sm:$0xff]  ;;  %v883_v11 = vld [vmem:[%s1315_s23 + $0x40] sm:$0xff] }
 0x36e   : >> { %872 = vst [vmem:[%s1311_s18 + $0x10] sm:$0xff] %v871_v5  ;;  %s1763_s5 = smov (%p932_p11, %s931_s5), 0  ;;  %v885_v12 = vld [vmem:[%s1315_s23 + $0x48] sm:$0xff]  ;;  %v887_v13 = vld [vmem:[%s1315_s23 + $0x50] sm:$0xff]  ;;  %v889_v14 = vld [vmem:[%s1315_s23 + $0x58] sm:$0xff] }
 0x36f   : >> { %874 = vst [vmem:[%s1311_s18 + $0x18] sm:$0xff] %v873_v6  ;;  %s1121_s6 = sshll.u32 %s1763_s5, 8  ;;  %v891_v15 = vld [vmem:[%s1315_s23 + $0x60] sm:$0xff]  ;;  %v893_v16 = vld [vmem:[%s1315_s23 + $0x68] sm:$0xff]  ;;  %v895_v17 = vld [vmem:[%s1315_s23 + $0x70] sm:$0xff]  ;;  %s1756_s24 = smov %s1763_s5 }
 0x370   : >> { %876 = vst [vmem:[%s1311_s18 + $0x20] sm:$0xff] %v875_v7  ;;  %s1660_s7 = scalar_lea.vmem %s1538_s20, %s1121_s6 [#allocation2]   ;;  %s1663_s8 = scalar_lea.vmem %s1611_s27, %s1121_s6   ;;  %v897_v18 = vld [vmem:[%s1315_s23 + $0x78] sm:$0xff]  ;;  %v899_v19 = vld [vmem:[%s1315_s23 + $0x80] sm:$0xff]  ;;  %v901_v20 = vld [vmem:[%s1315_s23 + $0x88] sm:$0xff] }
 0x371   : >> { %878 = vst [vmem:[%s1311_s18 + $0x28] sm:$0xff] %v877_v8  ;;  %v903_v21 = vld [vmem:[%s1315_s23 + $0x90] sm:$0xff]  ;;  %v905_v22 = vld [vmem:[%s1315_s23 + $0x98] sm:$0xff]  ;;  %v907_v23 = vld [vmem:[%s1315_s23 + $0xa0] sm:$0xff] }
 0x372   : >> { %880 = vst [vmem:[%s1311_s18 + $0x30] sm:$0xff] %v879_v9  ;;  %v909_v24 = vld [vmem:[%s1315_s23 + $0xa8] sm:$0xff]  ;;  %v911_v25 = vld [vmem:[%s1315_s23 + $0xb0] sm:$0xff]  ;;  %v913_v26 = vld [vmem:[%s1315_s23 + $0xb8] sm:$0xff] }
 0x373   : >> { %882 = vst [vmem:[%s1311_s18 + $0x38] sm:$0xff] %v881_v10  ;;  %v915_v27 = vld [vmem:[%s1315_s23 + $0xc0] sm:$0xff]  ;;  %v917_v28 = vld [vmem:[%s1315_s23 + $0xc8] sm:$0xff]  ;;  %v919_v29 = vld [vmem:[%s1315_s23 + $0xd0] sm:$0xff] }
 0x374   : >> { %884 = vst [vmem:[%s1311_s18 + $0x40] sm:$0xff] %v883_v11  ;;  %v921_v30 = vld [vmem:[%s1315_s23 + $0xd8] sm:$0xff]  ;;  %v923_v31 = vld [vmem:[%s1315_s23 + $0xe0] sm:$0xff]  ;;  %v925_v32 = vld [vmem:[%s1315_s23 + $0xe8] sm:$0xff] }
 0x375   : >> { %886 = vst [vmem:[%s1311_s18 + $0x48] sm:$0xff] %v885_v12  ;;  %v927_v33 = vld [vmem:[%s1315_s23 + $0xf0] sm:$0xff]  ;;  %v929_v34 = vld [vmem:[%s1315_s23 + $0xf8] sm:$0xff]  ;;  %s1755_s23 = smov %s1660_s7 }
 0x376   : >> { %888 = vst [vmem:[%s1311_s18 + $0x50] sm:$0xff] %v887_v13 }
 0x377   : >> { %890 = vst [vmem:[%s1311_s18 + $0x58] sm:$0xff] %v889_v14 }
 0x378   : >> { %892 = vst [vmem:[%s1311_s18 + $0x60] sm:$0xff] %v891_v15 }
 0x379   : >> { %894 = vst [vmem:[%s1311_s18 + $0x68] sm:$0xff] %v893_v16 }
 0x37a   : >> { %896 = vst [vmem:[%s1311_s18 + $0x70] sm:$0xff] %v895_v17 }
 0x37b   : >> { %898 = vst [vmem:[%s1311_s18 + $0x78] sm:$0xff] %v897_v18 }
 0x37c   : >> { %900 = vst [vmem:[%s1311_s18 + $0x80] sm:$0xff] %v899_v19 }
 0x37d   : >> { %902 = vst [vmem:[%s1311_s18 + $0x88] sm:$0xff] %v901_v20 }
 0x37e   : >> { %904 = vst [vmem:[%s1311_s18 + $0x90] sm:$0xff] %v903_v21 }
 0x37f   : >> { %906 = vst [vmem:[%s1311_s18 + $0x98] sm:$0xff] %v905_v22 }
 0x380   : >> { %908 = vst [vmem:[%s1311_s18 + $0xa0] sm:$0xff] %v907_v23 }
 0x381   : >> { %910 = vst [vmem:[%s1311_s18 + $0xa8] sm:$0xff] %v909_v24 }
 0x382   : >> { %912 = vst [vmem:[%s1311_s18 + $0xb0] sm:$0xff] %v911_v25 }
 0x383   : >> { %914 = vst [vmem:[%s1311_s18 + $0xb8] sm:$0xff] %v913_v26 }
 0x384   : >> { %916 = vst [vmem:[%s1311_s18 + $0xc0] sm:$0xff] %v915_v27 }
 0x385   : >> { %918 = vst [vmem:[%s1311_s18 + $0xc8] sm:$0xff] %v917_v28 }
 0x386   : >> { %920 = vst [vmem:[%s1311_s18 + $0xd0] sm:$0xff] %v919_v29 }
 0x387   : >> { %922 = vst [vmem:[%s1311_s18 + $0xd8] sm:$0xff] %v921_v30  ;;  %863 = sbr.rel (!%p860_p12) target bundleno = 875 (0x36b), region = 126 }
 0x388   : >> { %924 = vst [vmem:[%s1311_s18 + $0xe0] sm:$0xff] %v923_v31 }
 0x389   : >> { %926 = vst [vmem:[%s1311_s18 + $0xe8] sm:$0xff] %v925_v32 }
 0x38a   : >> { %928 = vst [vmem:[%s1311_s18 + $0xf0] sm:$0xff] %v927_v33 }
 0x38b   : >> { %930 = vst [vmem:[%s1311_s18 + $0xf8] sm:$0xff] %v929_v34  ;;  %s1754_s18 = smov %s1663_s8 }
 0x38c PF: > { %s1728_s9 = sand.u32 31, %s1761_s15   ;;  %s1132_s10 = sshll.u32 %s1617_s29, 8 }
 0x38d   : > { %s942_s11 = scalar_lea.vmem %s1538_s20, %s1132_s10 [#allocation2]   ;;  %s944_s12 = scalar_lea.vmem %s1611_s27, %s1132_s10  }
 0x38e   : > { %p1126_p13 = scmp.le.s32.totalorder %s1728_s9, 0 }
 0x38f   : > { %s1325_s13 = smov (!%p1126_p13), %s944_s12   ;;  %s1329_s14 = smov (!%p1126_p13), %s942_s11  }
 0x390   : > { %1035 = sbr.rel (%p1126_p13) target bundleno = 925 (0x39d), region = 131  ;;  %s1333_s17 = smov (!%p1126_p13), 0  }
 0x391   : > { %s1337_s21 = smov (!%p1126_p13), 0  }
 0x395 LB: >> { %v954_v35 = vld [vmem:[%s1331_s14] sm:$0xff]  ;;  %s956_s15 = sadd.s32 1, %s1335_s17  ;;  %s948_s21 = sadd.s32 1, %s1339_s21   ;;  %s1339_s21 = sphi %s1337_s21, %s948_s21   ;;  %s1335_s17 = sphi %s1333_s17, %s1334_s17   ;;  %s1331_s14 = sphi %s1329_s14, %s961_s14   ;;  %s1327_s13 = sphi %s1325_s13, %s962_s13  }
 0x396   : >> { %955 = vst [vmem:[%s1327_s13] sm:$0xff] %v954_v35  ;;  %p957_p0 = scmp.ge.s32.totalorder %s956_s15, %s1728_s9  ;;  %p947_p1 = scmp.ge.s32.totalorder %s948_s21, %s1728_s9 }
 0x398   : >> { %s1765_s15 = smov (%p957_p0, %s956_s15), 0  ;;  %950 = sbr.rel (!%p947_p1) target bundleno = 917 (0x395), region = 137 }
 0x399   : >> { %s1127_s20 = sshll.u32 %s1765_s15, 3  ;;  %s1334_s17 = smov %s1765_s15  }
 0x39a   : >> { %s961_s14 = scalar_lea.vmem %s942_s11, %s1127_s20 [#allocation2]   ;;  %s962_s13 = scalar_lea.vmem %s944_s12, %s1127_s20  }
 0x39d PF: > { %p11_p2 = scmp.ge.s32.totalorder %s1383_s19, 4   ;;  %s1757_s15 = smov %s1303_s16 }
 0x39e   : > { %s1758_s16 = smov %s1391_s22  ;;  %s1759_s17 = smov %s1383_s19 }
 0x39f   :  { %13 = sbr.rel (!%p11_p2) target bundleno = 2 (0x2), region = 148 }

</bundles_post_ra>
